<compile_context>
chip_gen: v5e
topology: v5e:2x2
jax: 0.10.0
libtpu: 0.0.40
codegen_flags: <defaults>
</compile_context>

<pallas_src>
import functools

import jax
import jax.numpy as jnp
import numpy as np
from jax.experimental import pallas as pl
from jax.experimental.pallas import tpu as pltpu


# ----------------------------------------------------------------------------
# Host-side parameter packing
# ----------------------------------------------------------------------------
def _reorder_gates(a, H):
    """PyTorch gate order (i, f, g, o) -> (i, f, o, g) along the last axis."""
    return jnp.concatenate(
        [a[..., :2 * H], a[..., 3 * H:4 * H], a[..., 2 * H:3 * H]], axis=-1)


def _pad_cols(a, C):
    return jnp.pad(a.astype(jnp.float32), ((0, 0), (0, C - a.shape[1])))


def pack_params(params, in_size, inner, H, L, out_size):
    """Pack every weight/bias into one (rows, C) f32 slab.

    Returns (slab, row_offsets, C).  Each logical block starts at a row offset
    that is a multiple of 8 (sublane aligned).  LSTM biases are pre-summed,
    gate columns are reordered to (i, f, o, g), and w_ih / w_hh are stacked
    back-to-back so each layer does ONE fused matmul."""
    C = max(4 * H, inner, out_size)
    blocks = []

    blocks.append(("w1", _pad_cols(params["w1"], C)))            # (in_size, C)
    blocks.append(("b_lin1", _pad_cols(params["b1"], C)))        # (1, C)

    for l in range(L):
        wih = _reorder_gates(params[f"w_ih{l}"].astype(jnp.float32), H)
        whh = _reorder_gates(params[f"w_hh{l}"].astype(jnp.float32), H)
        bsum = _reorder_gates(
            (params[f"b_ih{l}"] + params[f"b_hh{l}"]).astype(jnp.float32), H)
        if l == 0:
            # Layer-0 input is the lane-padded (B, C) lin1 activation; pad the
            # w_ih rows from `inner` up to C (padded activation lanes are 0).
            wih = jnp.pad(wih, ((0, C - wih.shape[0]), (0, 0)))
        w_stack = jnp.concatenate([wih, whh], axis=0)            # (din+H, 4H)
        blocks.append((f"w_lstm{l}", _pad_cols(w_stack, C)))
        blocks.append((f"b_lstm{l}", _pad_cols(bsum, C)))

    blocks.append(("w2", _pad_cols(params["w2"], C)))            # (H, C)
    blocks.append(("b_lin2", _pad_cols(params["b2"], C)))        # (1, C)

    offsets, parts, cur = {}, [], 0
    for name, a in blocks:
        assert name not in offsets, f"duplicate slab block name: {name}"
        pad = (-cur) % 8
        if pad:
            parts.append(jnp.zeros((pad, C), jnp.float32))
            cur += pad
        offsets[name] = cur
        parts.append(a)
        cur += a.shape[0]
    pad = (-cur) % 8
    if pad:
        parts.append(jnp.zeros((pad, C), jnp.float32))
        cur += pad
    return jnp.concatenate(parts, axis=0), offsets, C


def pack_hidden(h, c):
    """(L,B,H),(L,B,H) -> lane-dense (B, 2*L*H): lanes [l*H:(l+1)*H] = h[l],
    lanes [(L+l)*H:(L+l+1)*H] = c[l]."""
    L, B, H = h.shape
    return jnp.concatenate(
        [h.transpose(1, 0, 2).reshape(B, L * H),
         c.transpose(1, 0, 2).reshape(B, L * H)], axis=1).astype(jnp.float32)


def unpack_hidden(state, L, H):
    B = state.shape[0]
    h = state[:, :L * H].reshape(B, L, H).transpose(1, 0, 2)
    c = state[:, L * H:].reshape(B, L, H).transpose(1, 0, 2)
    return h, c


# ----------------------------------------------------------------------------
# Kernel
# ----------------------------------------------------------------------------
def make_drqn_kernel(in_size, H, L, C, off):
    def kernel(x_ref, p_ref, sin_ref, q_ref, sout_ref, st):
        t = pl.program_id(0)

        # Load the carried recurrent state into VMEM scratch at step 0.
        @pl.when(t == 0)
        def _():
            st[...] = sin_ref[...]

        # lin1 + ReLU (dropout_prob = 0 -> dropout is the identity).
        x = x_ref[0]                                              # (B, in_size)
        w1 = p_ref[off["w1"]:off["w1"] + in_size, :]              # (in_size, C)
        b1 = p_ref[off["b_lin1"]:off["b_lin1"] + 1, :]            # (1, C)
        inp = jnp.maximum(
            jnp.dot(x, w1, preferred_element_type=jnp.float32) + b1, 0.0)  # (B, C)

        prev = st[...]                                            # (B, 2*L*H)
        hs, cs = [], []
        for l in range(L):
            din = C if l == 0 else H
            wl = off[f"w_lstm{l}"]
            w = p_ref[wl:wl + din + H, :]                         # (din+H, C)
            b = p_ref[off[f"b_lstm{l}"]:off[f"b_lstm{l}"] + 1, :]
            h_prev = prev[:, l * H:(l + 1) * H]                   # (B, H)
            c_prev = prev[:, (L + l) * H:(L + l + 1) * H]         # (B, H)
            # One fused matmul per layer over concat([input, h_prev]).
            z = jnp.concatenate([inp, h_prev], axis=1)            # (B, din+H)
            gates = jnp.dot(z, w, preferred_element_type=jnp.float32) + b  # (B, C)
            # Packed gate order is (i, f, o, g): one tanh-based sigmoid over
            # the first 3H lanes, one tanh over the next H lanes.
            sig = 0.5 * jnp.tanh(0.5 * gates[:, :3 * H]) + 0.5
            i_g = sig[:, 0 * H:1 * H]
            f_g = sig[:, 1 * H:2 * H]
            o_g = sig[:, 2 * H:3 * H]
            g_g = jnp.tanh(gates[:, 3 * H:4 * H])
            c_new = f_g * c_prev + i_g * g_g
            h_new = o_g * jnp.tanh(c_new)
            hs.append(h_new)
            cs.append(c_new)
            inp = h_new                                           # (B, H)

        # Carry the state across grid steps: one dense (B, 2*L*H) store.
        st[...] = jnp.concatenate(hs + cs, axis=1)

        # lin2(ReLU(h_last)) -> lane-dense (B, C) slab; padded cols are 0.
        w2 = p_ref[off["w2"]:off["w2"] + H, :]
        b2 = p_ref[off["b_lin2"]:off["b_lin2"] + 1, :]
        q_ref[0] = (jnp.dot(jnp.maximum(inp, 0.0), w2,
                            preferred_element_type=jnp.float32) + b2)

        # Emit the final recurrent state once, at the last rollout step.
        @pl.when(t == pl.num_programs(0) - 1)
        def _():
            sout_ref[...] = st[...]

    return kernel


# ----------------------------------------------------------------------------
# Wrapper: T-step rollout in one pallas_call
# ----------------------------------------------------------------------------
def drqn_rollout(x_seq, slab, state_in, *, in_size, inner, H, L, out_size, C, off):
    """x_seq: (T, B, ...) per-step observations (each flattened like
    x.view(B, 1, -1)).  state_in: packed (B, 2*L*H) recurrent state.
    Returns (q of shape (T, B, 1, out_size), packed state_out (B, 2*L*H))."""
    T, B = x_seq.shape[0], x_seq.shape[1]
    x_flat = x_seq.reshape(T, B, -1).astype(jnp.float32)
    assert x_flat.shape[-1] == in_size
    rows = slab.shape[0]

    flops = 2 * T * B * (in_size * inner
                         + sum(((C if l == 0 else H) + H) * 4 * H for l in range(L))
                         + H * out_size)
    cost = pl.CostEstimate(
        flops=flops,
        transcendentals=T * B * L * 5 * H,
        bytes_accessed=4 * (x_flat.size + slab.size + 2 * state_in.size + T * B * C))

    q_pad, state_out = pl.pallas_call(
        make_drqn_kernel(in_size, H, L, C, off),
        grid=(T,),
        in_specs=[
            pl.BlockSpec((1, B, in_size), lambda t: (t, 0, 0)),   # x, per step
            pl.BlockSpec((rows, C), lambda t: (0, 0)),            # slab, resident
            pl.BlockSpec((B, 2 * L * H), lambda t: (0, 0)),       # state in
        ],
        out_specs=(
            pl.BlockSpec((1, B, C), lambda t: (t, 0, 0)),         # q, per step
            pl.BlockSpec((B, 2 * L * H), lambda t: (0, 0)),       # state out
        ),
        out_shape=(jax.ShapeDtypeStruct((T, B, C), jnp.float32),
                   jax.ShapeDtypeStruct((B, 2 * L * H), jnp.float32)),
        scratch_shapes=[pltpu.VMEM((B, 2 * L * H), jnp.float32)],
        input_output_aliases={2: 1},                              # state in -> out
        compiler_params=pltpu.CompilerParams(
            dimension_semantics=("arbitrary",),
            vmem_limit_bytes=16 * 1024 * 1024),
        cost_estimate=cost,
    )(x_flat, slab, state_in)

    q = q_pad[:, :, :out_size].reshape(T, B, 1, out_size)   # slice once per segment
    return q, state_out


# ----------------------------------------------------------------------------
# Synthetic params (PyTorch-style inits, weights stored transposed (in, out))
# ----------------------------------------------------------------------------
def init_params(key, in_size, out_size, inner_linear_dim, hidden_dim, lstm_layers):
    params = {}
    ks = jax.random.split(key, 4 + 4 * lstm_layers)
    k_iter = iter(ks)

    def u(k, shape, bound):
        return jax.random.uniform(k, shape, jnp.float32, -bound, bound)

    b1 = 1.0 / np.sqrt(in_size)
    params["w1"] = u(next(k_iter), (in_size, inner_linear_dim), b1)
    params["b1"] = u(next(k_iter), (1, inner_linear_dim), b1)

    bh = 1.0 / np.sqrt(hidden_dim)
    for l in range(lstm_layers):
        in_dim = inner_linear_dim if l == 0 else hidden_dim
        params[f"w_ih{l}"] = u(next(k_iter), (in_dim, 4 * hidden_dim), bh)
        params[f"w_hh{l}"] = u(next(k_iter), (hidden_dim, 4 * hidden_dim), bh)
        params[f"b_ih{l}"] = u(next(k_iter), (1, 4 * hidden_dim), bh)
        params[f"b_hh{l}"] = u(next(k_iter), (1, 4 * hidden_dim), bh)

    b2 = 1.0 / np.sqrt(hidden_dim)
    params["w2"] = u(next(k_iter), (hidden_dim, out_size), b2)
    params["b2"] = u(next(k_iter), (1, out_size), b2)
    return params


# ----------------------------------------------------------------------------
# Pure-JAX reference (original unpacked params, PyTorch gate order)
# ----------------------------------------------------------------------------
def drqn_reference_step(x, params, hidden):
    h0, c0 = hidden
    B = x.shape[0]
    num_layers, _, H = h0.shape
    xf = x.reshape(B, -1).astype(jnp.float32)
    inp = jnp.maximum(xf @ params["w1"] + params["b1"], 0.0)
    hs, cs = [], []
    for l in range(num_layers):
        gates = (inp @ params[f"w_ih{l}"] + params[f"b_ih{l}"]
                 + h0[l] @ params[f"w_hh{l}"] + params[f"b_hh{l}"])
        i_g = jax.nn.sigmoid(gates[:, :H])
        f_g = jax.nn.sigmoid(gates[:, H:2 * H])
        g_g = jnp.tanh(gates[:, 2 * H:3 * H])
        o_g = jax.nn.sigmoid(gates[:, 3 * H:])
        c_new = f_g * c0[l] + i_g * g_g
        h_new = o_g * jnp.tanh(c_new)
        hs.append(h_new)
        cs.append(c_new)
        inp = h_new
    q = jnp.maximum(inp, 0.0) @ params["w2"] + params["b2"]
    return q.reshape(B, 1, -1), (jnp.stack(hs), jnp.stack(cs))


def drqn_reference_rollout(x_seq, params, hidden):
    h, c = hidden
    qs = []
    for t in range(x_seq.shape[0]):
        q, (h, c) = drqn_reference_step(x_seq[t], params, (h, c))
        qs.append(q)
    return jnp.stack(qs), (h, c)


if __name__ == "__main__":
    # Shapes consistent with the module: in_size=16 (a (4,2,2) obs flattened),
    # inner_linear_dim=32, hidden_dim=32, lstm_layers=2, out_size=4, batch=8,
    # rollout length T=8 per kernel launch.
    T, B, in_size, inner, hidden, layers, out_size = 8, 8, 16, 32, 32, 2, 4

    key = jax.random.PRNGKey(0)
    kx1, kx2, kp = jax.random.split(key, 3)
    x1 = jax.random.normal(kx1, (T, B, 4, 2, 2), dtype=jnp.float32)
    x2 = jax.random.normal(kx2, (T, B, 4, 2, 2), dtype=jnp.float32)
    params = init_params(kp, in_size, out_size, inner, hidden, layers)

    slab, off, C = pack_params(params, in_size, inner, hidden, layers, out_size)
    fwd = functools.partial(drqn_rollout, in_size=in_size, inner=inner, H=hidden,
                            L=layers, out_size=out_size, C=C, off=off)

    # init_hidden(): zeros of shape (lstm_layers, batch, hidden_dim), packed.
    h0 = jnp.zeros((layers, B, hidden), jnp.float32)
    c0 = jnp.zeros((layers, B, hidden), jnp.float32)
    s0 = pack_hidden(h0, c0)

    rtol, atol = 1e-3, 1e-4

    # ---- segment 1: zero initial state ------------------------------------
    q1, s1 = fwd(x1, slab, s0)
    h1, c1 = unpack_hidden(s1, layers, hidden)
    jax.block_until_ready((q1, h1, c1))

    q1_r, (h1_r, c1_r) = drqn_reference_rollout(x1, params, (h0, c0))
    np.testing.assert_allclose(np.asarray(q1), np.asarray(q1_r), rtol=rtol, atol=atol)
    np.testing.assert_allclose(np.asarray(h1), np.asarray(h1_r), rtol=rtol, atol=atol)
    np.testing.assert_allclose(np.asarray(c1), np.asarray(c1_r), rtol=rtol, atol=atol)

    # ---- segment 2: carried non-zero state (exercises the w_hh path) ------
    q2, s2 = fwd(x2, slab, s1)
    h2, c2 = unpack_hidden(s2, layers, hidden)
    jax.block_until_ready((q2, h2, c2))

    q2_r, (h2_r, c2_r) = drqn_reference_rollout(x2, params, (h1_r, c1_r))
    np.testing.assert_allclose(np.asarray(q2), np.asarray(q2_r), rtol=rtol, atol=atol)
    np.testing.assert_allclose(np.asarray(h2), np.asarray(h2_r), rtol=rtol, atol=atol)
    np.testing.assert_allclose(np.asarray(c2), np.asarray(c2_r), rtol=rtol, atol=atol)

    print("KERNEL_OK")
</pallas_src>

<mosaic_0001>
module attributes {stable_mosaic.version = 11 : i64} {
  func.func @kernel(%arg0: i32, %arg1: memref<1x8x16xf32, #tpu.memory_space<vmem>>, %arg2: memref<304x128xf32, #tpu.memory_space<vmem>>, %arg3: memref<8x128xf32, #tpu.memory_space<vmem>>, %arg4: memref<1x8x128xf32, #tpu.memory_space<vmem>>, %arg5: memref<8x128xf32, #tpu.memory_space<vmem>>, %arg6: memref<8x128xf32, #tpu.memory_space<vmem>>) attributes {dimension_semantics = [#tpu.dimension_semantics<arbitrary>], iteration_bounds = array<i64: 8>, scalar_prefetch = 0 : i64, scratch_operands = 1 : i64, tpu.core_type = #tpu.core_type<tc>, window_params = [{transform_indices = @transform_0, window_bounds = array<i64: 1, 8, 16>}, {pipeline_mode = #tpu.pipeline_mode<synchronous>, transform_indices = @transform_1, window_bounds = array<i64: 304, 128>}, {pipeline_mode = #tpu.pipeline_mode<synchronous>, transform_indices = @transform_2, window_bounds = array<i64: 8, 128>}, {transform_indices = @transform_3, window_bounds = array<i64: 1, 8, 128>}, {pipeline_mode = #tpu.pipeline_mode<synchronous>, transform_indices = @transform_4, window_bounds = array<i64: 8, 128>}]} {
    %c0_i32 = arith.constant 0 : i32
    %0 = arith.cmpi eq, %arg0, %c0_i32 : i32
    %1 = arith.extui %0 : i1 to i32
    %c0_i32_0 = arith.constant 0 : i32
    %2 = arith.cmpi ne, %1, %c0_i32_0 : i32
    scf.if %2 {
      %c0_31 = arith.constant 0 : index
      %c0_32 = arith.constant 0 : index
      %80 = vector.load %arg3[%c0_31, %c0_32] : memref<8x128xf32, #tpu.memory_space<vmem>>, vector<8x128xf32>
      %c0_33 = arith.constant 0 : index
      %c0_34 = arith.constant 0 : index
      %81 = vector.load %arg6[%c0_33, %c0_34] : memref<8x128xf32, #tpu.memory_space<vmem>>, vector<8x128xf32>
      tpu.vector_store %arg6[%c0_33, %c0_34], %80 {strides = array<i32>} : memref<8x128xf32, #tpu.memory_space<vmem>>, vector<8x128xf32>,
    } else {
    }
    %c0 = arith.constant 0 : index
    %c0_1 = arith.constant 0 : index
    %c0_2 = arith.constant 0 : index
    %3 = vector.load %arg1[%c0, %c0_1, %c0_2] : memref<1x8x16xf32, #tpu.memory_space<vmem>>, vector<1x8x16xf32>
    %4 = vector.shape_cast %3 : vector<1x8x16xf32> to vector<8x16xf32>
    %c0_3 = arith.constant 0 : index
    %c0_4 = arith.constant 0 : index
    %5 = vector.load %arg2[%c0_3, %c0_4] : memref<304x128xf32, #tpu.memory_space<vmem>>, vector<16x128xf32>
    %c16 = arith.constant 16 : index
    %c0_5 = arith.constant 0 : index
    %6 = vector.load %arg2[%c16, %c0_5] : memref<304x128xf32, #tpu.memory_space<vmem>>, vector<1x128xf32>
    %cst = arith.constant dense<0.000000e+00> : vector<8x128xf32>
    %7 = tpu.matmul %4, %5, %cst {dimension_numbers = #tpu.dot_dimension_numbers<[1], [0], [0], [1], [0, 0, 1, 1], [], []>} : vector<8x16xf32>, vector<16x128xf32>, vector<8x128xf32> -> vector<8x128xf32>
    %8 = vector.broadcast %6 : vector<1x128xf32> to vector<8x128xf32>
    %9 = arith.addf %7, %8 : vector<8x128xf32>
    %cst_6 = arith.constant 0.000000e+00 : f32
    %10 = vector.broadcast %cst_6 : f32 to vector<8x128xf32>
    %11 = arith.maximumf %9, %10 : vector<8x128xf32>
    %c0_7 = arith.constant 0 : index
    %c0_8 = arith.constant 0 : index
    %12 = vector.load %arg6[%c0_7, %c0_8] : memref<8x128xf32, #tpu.memory_space<vmem>>, vector<8x128xf32>
    %c24 = arith.constant 24 : index
    %c0_9 = arith.constant 0 : index
    %13 = vector.load %arg2[%c24, %c0_9] : memref<304x128xf32, #tpu.memory_space<vmem>>, vector<160x128xf32>
    %c184 = arith.constant 184 : index
    %c0_10 = arith.constant 0 : index
    %14 = vector.load %arg2[%c184, %c0_10] : memref<304x128xf32, #tpu.memory_space<vmem>>, vector<1x128xf32>
    %15 = vector.extract_strided_slice %12 {offsets = [0, 0], sizes = [8, 32], strides = [1, 1]} : vector<8x128xf32> to vector<8x32xf32>
    %16 = vector.extract_strided_slice %12 {offsets = [0, 64], sizes = [8, 32], strides = [1, 1]} : vector<8x128xf32> to vector<8x32xf32>
    %17 = tpu.concatenate %11, %15 in 1 : vector<8x128xf32>, vector<8x32xf32> -> vector<8x160xf32>
    %cst_11 = arith.constant dense<0.000000e+00> : vector<8x128xf32>
    %18 = tpu.matmul %17, %13, %cst_11 {dimension_numbers = #tpu.dot_dimension_numbers<[1], [0], [0], [1], [0, 0, 1, 1], [], []>} : vector<8x160xf32>, vector<160x128xf32>, vector<8x128xf32> -> vector<8x128xf32>
    %19 = vector.broadcast %14 : vector<1x128xf32> to vector<8x128xf32>
    %20 = arith.addf %18, %19 : vector<8x128xf32>
    %21 = vector.extract_strided_slice %20 {offsets = [0, 0], sizes = [8, 96], strides = [1, 1]} : vector<8x128xf32> to vector<8x96xf32>
    %cst_12 = arith.constant 5.000000e-01 : f32
    %22 = vector.broadcast %cst_12 : f32 to vector<8x96xf32>
    %23 = arith.mulf %22, %21 : vector<8x96xf32>
    %24 = math.tanh %23 : vector<8x96xf32>
    %cst_13 = arith.constant 5.000000e-01 : f32
    %25 = vector.broadcast %cst_13 : f32 to vector<8x96xf32>
    %26 = arith.mulf %25, %24 : vector<8x96xf32>
    %cst_14 = arith.constant 5.000000e-01 : f32
    %27 = vector.broadcast %cst_14 : f32 to vector<8x96xf32>
    %28 = arith.addf %26, %27 : vector<8x96xf32>
    %29 = vector.extract_strided_slice %28 {offsets = [0, 0], sizes = [8, 32], strides = [1, 1]} : vector<8x96xf32> to vector<8x32xf32>
    %30 = vector.extract_strided_slice %28 {offsets = [0, 32], sizes = [8, 32], strides = [1, 1]} : vector<8x96xf32> to vector<8x32xf32>
    %31 = vector.extract_strided_slice %28 {offsets = [0, 64], sizes = [8, 32], strides = [1, 1]} : vector<8x96xf32> to vector<8x32xf32>
    %32 = vector.extract_strided_slice %20 {offsets = [0, 96], sizes = [8, 32], strides = [1, 1]} : vector<8x128xf32> to vector<8x32xf32>
    %33 = math.tanh %32 : vector<8x32xf32>
    %34 = arith.mulf %30, %16 : vector<8x32xf32>
    %35 = arith.mulf %29, %33 : vector<8x32xf32>
    %36 = arith.addf %34, %35 : vector<8x32xf32>
    %37 = math.tanh %36 : vector<8x32xf32>
    %38 = arith.mulf %31, %37 : vector<8x32xf32>
    %c192 = arith.constant 192 : index
    %c0_15 = arith.constant 0 : index
    %39 = vector.load %arg2[%c192, %c0_15] : memref<304x128xf32, #tpu.memory_space<vmem>>, vector<64x128xf32>
    %c256 = arith.constant 256 : index
    %c0_16 = arith.constant 0 : index
    %40 = vector.load %arg2[%c256, %c0_16] : memref<304x128xf32, #tpu.memory_space<vmem>>, vector<1x128xf32>
    %41 = vector.extract_strided_slice %12 {offsets = [0, 32], sizes = [8, 32], strides = [1, 1]} : vector<8x128xf32> to vector<8x32xf32>
    %42 = vector.extract_strided_slice %12 {offsets = [0, 96], sizes = [8, 32], strides = [1, 1]} : vector<8x128xf32> to vector<8x32xf32>
    %43 = tpu.concatenate %38, %41 in 1 : vector<8x32xf32>, vector<8x32xf32> -> vector<8x64xf32>
    %cst_17 = arith.constant dense<0.000000e+00> : vector<8x128xf32>
    %44 = tpu.matmul %43, %39, %cst_17 {dimension_numbers = #tpu.dot_dimension_numbers<[1], [0], [0], [1], [0, 0, 1, 1], [], []>} : vector<8x64xf32>, vector<64x128xf32>, vector<8x128xf32> -> vector<8x128xf32>
    %45 = vector.broadcast %40 : vector<1x128xf32> to vector<8x128xf32>
    %46 = arith.addf %44, %45 : vector<8x128xf32>
    %47 = vector.extract_strided_slice %46 {offsets = [0, 0], sizes = [8, 96], strides = [1, 1]} : vector<8x128xf32> to vector<8x96xf32>
    %cst_18 = arith.constant 5.000000e-01 : f32
    %48 = vector.broadcast %cst_18 : f32 to vector<8x96xf32>
    %49 = arith.mulf %48, %47 : vector<8x96xf32>
    %50 = math.tanh %49 : vector<8x96xf32>
    %cst_19 = arith.constant 5.000000e-01 : f32
    %51 = vector.broadcast %cst_19 : f32 to vector<8x96xf32>
    %52 = arith.mulf %51, %50 : vector<8x96xf32>
    %cst_20 = arith.constant 5.000000e-01 : f32
    %53 = vector.broadcast %cst_20 : f32 to vector<8x96xf32>
    %54 = arith.addf %52, %53 : vector<8x96xf32>
    %55 = vector.extract_strided_slice %54 {offsets = [0, 0], sizes = [8, 32], strides = [1, 1]} : vector<8x96xf32> to vector<8x32xf32>
    %56 = vector.extract_strided_slice %54 {offsets = [0, 32], sizes = [8, 32], strides = [1, 1]} : vector<8x96xf32> to vector<8x32xf32>
    %57 = vector.extract_strided_slice %54 {offsets = [0, 64], sizes = [8, 32], strides = [1, 1]} : vector<8x96xf32> to vector<8x32xf32>
    %58 = vector.extract_strided_slice %46 {offsets = [0, 96], sizes = [8, 32], strides = [1, 1]} : vector<8x128xf32> to vector<8x32xf32>
    %59 = math.tanh %58 : vector<8x32xf32>
    %60 = arith.mulf %56, %42 : vector<8x32xf32>
    %61 = arith.mulf %55, %59 : vector<8x32xf32>
    %62 = arith.addf %60, %61 : vector<8x32xf32>
    %63 = math.tanh %62 : vector<8x32xf32>
    %64 = arith.mulf %57, %63 : vector<8x32xf32>
    %65 = tpu.concatenate %38, %64, %36, %62 in 1 : vector<8x32xf32>, vector<8x32xf32>, vector<8x32xf32>, vector<8x32xf32> -> vector<8x128xf32>
    %c0_21 = arith.constant 0 : index
    %c0_22 = arith.constant 0 : index
    %66 = vector.load %arg6[%c0_21, %c0_22] : memref<8x128xf32, #tpu.memory_space<vmem>>, vector<8x128xf32>
    tpu.vector_store %arg6[%c0_21, %c0_22], %65 {strides = array<i32>} : memref<8x128xf32, #tpu.memory_space<vmem>>, vector<8x128xf32>,
    %c264 = arith.constant 264 : index
    %c0_23 = arith.constant 0 : index
    %67 = vector.load %arg2[%c264, %c0_23] : memref<304x128xf32, #tpu.memory_space<vmem>>, vector<32x128xf32>
    %c296 = arith.constant 296 : index
    %c0_24 = arith.constant 0 : index
    %68 = vector.load %arg2[%c296, %c0_24] : memref<304x128xf32, #tpu.memory_space<vmem>>, vector<1x128xf32>
    %cst_25 = arith.constant 0.000000e+00 : f32
    %69 = vector.broadcast %cst_25 : f32 to vector<8x32xf32>
    %70 = arith.maximumf %64, %69 : vector<8x32xf32>
    %cst_26 = arith.constant dense<0.000000e+00> : vector<8x128xf32>
    %71 = tpu.matmul %70, %67, %cst_26 {dimension_numbers = #tpu.dot_dimension_numbers<[1], [0], [0], [1], [0, 0, 1, 1], [], []>} : vector<8x32xf32>, vector<32x128xf32>, vector<8x128xf32> -> vector<8x128xf32>
    %72 = vector.broadcast %68 : vector<1x128xf32> to vector<8x128xf32>
    %73 = arith.addf %71, %72 : vector<8x128xf32>
    %c0_27 = arith.constant 0 : index
    %c0_28 = arith.constant 0 : index
    %c0_29 = arith.constant 0 : index
    %74 = vector.load %arg4[%c0_27, %c0_28, %c0_29] : memref<1x8x128xf32, #tpu.memory_space<vmem>>, vector<1x8x128xf32>
    %75 = vector.shape_cast %74 : vector<1x8x128xf32> to vector<8x128xf32>
    %76 = vector.shape_cast %73 : vector<8x128xf32> to vector<1x8x128xf32>
    tpu.vector_store %arg4[%c0_27, %c0_28, %c0_29], %76 {strides = array<i32>} : memref<1x8x128xf32, #tpu.memory_space<vmem>>, vector<1x8x128xf32>,
    %c7_i32 = arith.constant 7 : i32
    %77 = arith.cmpi eq, %arg0, %c7_i32 : i32
    %78 = arith.extui %77 : i1 to i32
    %c0_i32_30 = arith.constant 0 : i32
    %79 = arith.cmpi ne, %78, %c0_i32_30 : i32
    scf.if %79 {
      %c0_31 = arith.constant 0 : index
      %c0_32 = arith.constant 0 : index
      %80 = vector.load %arg6[%c0_31, %c0_32] : memref<8x128xf32, #tpu.memory_space<vmem>>, vector<8x128xf32>
      %c0_33 = arith.constant 0 : index
      %c0_34 = arith.constant 0 : index
      %81 = vector.load %arg5[%c0_33, %c0_34] : memref<8x128xf32, #tpu.memory_space<vmem>>, vector<8x128xf32>
      tpu.vector_store %arg5[%c0_33, %c0_34], %80 {strides = array<i32>} : memref<8x128xf32, #tpu.memory_space<vmem>>, vector<8x128xf32>,
    } else {
    }
    return
  }
  func.func @transform_0(%arg0: i32) -> (i32, i32, i32) {
    %c0_i32 = arith.constant 0 : i32
    %c0_i32_0 = arith.constant 0 : i32
    %c0_i32_1 = arith.constant 0 : i32
    return %arg0, %c0_i32, %c0_i32_0 : i32, i32, i32
  }
  func.func @transform_1(%arg0: i32) -> (i32, i32) {
    %c0_i32 = arith.constant 0 : i32
    %c0_i32_0 = arith.constant 0 : i32
    %c0_i32_1 = arith.constant 0 : i32
    return %c0_i32, %c0_i32_0 : i32, i32
  }
  func.func @transform_2(%arg0: i32) -> (i32, i32) {
    %c0_i32 = arith.constant 0 : i32
    %c0_i32_0 = arith.constant 0 : i32
    %c0_i32_1 = arith.constant 0 : i32
    return %c0_i32, %c0_i32_0 : i32, i32
  }
  func.func @transform_3(%arg0: i32) -> (i32, i32, i32) {
    %c0_i32 = arith.constant 0 : i32
    %c0_i32_0 = arith.constant 0 : i32
    %c0_i32_1 = arith.constant 0 : i32
    return %arg0, %c0_i32, %c0_i32_0 : i32, i32, i32
  }
  func.func @transform_4(%arg0: i32) -> (i32, i32) {
    %c0_i32 = arith.constant 0 : i32
    %c0_i32_0 = arith.constant 0 : i32
    %c0_i32_1 = arith.constant 0 : i32
    return %c0_i32, %c0_i32_0 : i32, i32
  }
}

</mosaic_0001>

<bundles_post_ra>
// kernel: tpu_custom_call.1
= control target key start
LH: loop header
LB: loop body
LE: loop exit
PB: predicated region body
PF: predicated region fallthrough
CT: control target
= control target key end

     0   :  { %10 = vsyncpa [#allocation4], 0  ;;  %s1149_s0 = inlined_call_operand.hbm [shape: f32[8,8,16], index: 0, kind: input, shape index: {}]   ;;  %s1150_s1 = inlined_call_operand.hbm [shape: f32[304,128], index: 1, kind: input, shape index: {}]   ;;  %s1151_s2 = inlined_call_operand.hbm [shape: f32[8,128], index: 2, kind: input, shape index: {}, may-alias: {2,4}]   ;;  %s1152_s3 = inlined_call_operand.hbm [shape: f32[8,8,128], index: 3, kind: output, shape index: {0}]   ;;  %s1153_s4 = inlined_call_operand.hbm [shape: f32[8,128], index: 4, kind: output, shape index: {1}, may-alias: {2,4}]  }
   0x1   :  { %12 = vsyncpa [#allocation4 + $0x1], 0 }
   0x2   :  { %13 = vsyncpa [#allocation7], 0 }
   0x3   :  { %14 = vsyncpa [#allocation5], 0 }
   0x4   :  { %16 = vsyncpa [#allocation5 + $0x1], 0 }
   0x5   :  { %17 = vsyncpa [#allocation11], 0  ;;  %s968_s15 = smov 0   ;;  %s970_s16 = smov 0  }
   0x6   :  { %s972_s17 = smov 0   ;;  %s974_s18 = smov 0  }
   0x7 LB: > { %s154_s21 = sshll.u32 %s1150_s1, 4  ;;  %s992_s22 = sadd.s32 4294967295, %s933_s18   ;;  %s933_s18 = sphi %s974_s18, %s1168_s18   ;;  %s929_s17 = sphi %s972_s17, %s1167_s17   ;;  %s925_s16 = sphi %s970_s16, %s1166_s16   ;;  %s921_s15 = sphi %s968_s15, %s1165_s15   ;;  %s155_s21 = int_to_ptr.hbm [resolvable:$true] %s154_s21 }
   0x8   : > { %p623_p0 = scmp.ge.s32.totalorder %s933_s18, 1  ;;  %p44_p1 = scmp.eq.s32.totalorder %s992_s22, 0 }
   0x9   : > { %p143_p2 = scmp.lt.s32.totalorder %s933_s18, 9  ;;  %s935_s24 = smov [#allocation6]  }
   0xa   : > { %s156_s25 = sshll.u32 %s935_s24, 4  ;;  %s169_s28 = sshll.u32 %s1151_s2, 4  ;;  %s157_s25 = int_to_ptr.vmem [resolvable:$true] %s156_s25  ;;  %s170_s28 = int_to_ptr.hbm [resolvable:$true] %s169_s28 }
   0xb   : > { %p998_p4 = pnand %p623_p0, %p143_p2  ;;  %s936_s29 = smov [#allocation8]  }
   0xc   : > { %s171_s30 = sshll.u32 %s936_s29, 4  ;;  %s937_s5 = smov 128   ;;  %s172_s30 = int_to_ptr.vmem [resolvable:$true] %s171_s30 }
   0xd   : > { %p662_p5 = pneg %p998_p4  ;;  %s938_s6 = smov 8  }
   0xe   : > { %s622_s7 = sadd.s32 4294967294, %s933_s18   ;;  %s1011_s8 = sadd.s32 1, %s933_s18  }
   0xf   : > { %p663_p6 = pnand %p662_p5, %p44_p1  ;;  %s27_s9 = ssub.s32 %s933_s18, %s1011_s8 }
  0x10   : > { %s30_s10 = sadd.s32 1, %s929_s17  ;;  %p28_p7 = scmp.eq.s32.totalorder %s27_s9, 0 }
  0x11   : > { %665 = dma.hbm_to_vmem [thread:$0]  (!%p663_p6), %s155_s21, 4864, %s157_s25, [#allocation7], %s937_s5, %s937_s5, %s938_s6  }
  0x12   : > { %668 = dma.hbm_to_vmem [thread:$0]  (!%p663_p6), %s170_s28, 128, %s172_s30, [#allocation7]  }
  0x13   : > { %p37_p8 = scmp.ne.s32.totalorder %s929_s17, %s925_s16  ;;  %p38_p9 = scmp.eq.s32.totalorder %s933_s18, 0 }
  0x14   : > { %p43_p10 = scmp.ne.s32.totalorder %s925_s16, %s921_s15  ;;  %p1154_p13 = scmp.eq.s32.totalorder %s992_s22, 7 }
  0x15   : > { %s1022_s11 = scalar_select %p28_p7, %s929_s17, %s30_s10  }
  0x16   : > { %p1024_p11 = por %p38_p9, %p37_p8  ;;  %p1030_p12 = por %p44_p1, %p43_p10 }
  0x17   : > { %p115_p0 = scmp.eq.s32.totalorder %s622_s7, 7  ;;  %p679_p2 = scmp.lt.s32.totalorder %s933_s18, 8 }
  0x18   : > { %s182_s14 = sand.u32 1, %s929_s17   ;;  %p1039_p5 = por %p1154_p13, %p37_p8 }
  0x19   : > { %p1043_p6 = por %p115_p0, %p43_p10  ;;  %s627_s21 = sshll.u32 %s182_s14, 3 }
  0x1a   : > { %s628_s24 = sshll.u32 %s933_s18, 3  ;;  %s186_s28 = scalar_lea.vmem [#allocation3], %s627_s21 }
  0x1b   : > { %s190_s27 = scalar_lea.hbm %s1149_s0, %s628_s24  ;;  %s194_s29 = sshll.u32 %s186_s28, 4  ;;  %s195_s29 = int_to_ptr.vmem [resolvable:$true] %s194_s29 }
  0x1c   : > { %s192_s30 = sshll.u32 %s190_s27, 4  ;;  %p1053_p7 = pnand %p679_p2, %p1024_p11  ;;  %s193_s30 = int_to_ptr.hbm [resolvable:$true] %s192_s30 }
  0x1d   : > { %s183_s6 = scalar_lea.sflag [#allocation4], %s182_s14  ;;  %s801_s7 = sshra.s32 %s193_s30, 4  ;;  %s802_s7 = int_to_ptr.hbm [resolvable:$true] %s801_s7 }
  0x1e   : > { %s803_s9 = scalar_lea.hbm %s802_s7, 8  ;;  %p805_p9 = pneg %p1053_p7 }
  0x1f   : > { %p804_p8 = scmp.ne.s32.totalorder %s802_s7, %s803_s9  ;;  %s808_s24 = scalar_lea.hbm %s1149_s0, 64 }
  0x20   : > { %p809_p11 = scmp.lt.s32.totalorder %s802_s7, %s1149_s0  ;;  %p810_p2 = scmp.lt.s32.totalorder %s808_s24, %s803_s9 }
  0x21   : > { %p806_p10 = pnand %p805_p9, %p804_p8 }
  0x22   : > { %p811_p13 = por %p810_p2, %p809_p11 }
  0x23   : > { %p807_p0 = pneg %p806_p10 }
  0x25   : > { %p812_p3 = pnand %p811_p13, %p807_p0 }
  0x27   : > { %815 = shalt.err (!%p812_p3)
}
  0x28   : > { %672 = dma.hbm_to_vmem [thread:$0]  (!%p1053_p7), %s193_s30, 128, %s195_s29, %s183_s6  }
  0x29   : > { %203 = sbr.rel (%p998_p4) target bundleno = 1501 (0x5dd), region = 32  ;;  %s1070_s14 = sand.u32 (!%p998_p4), 1, %s925_s16  }
  0x2a   : > { %s630_s26 = sshll.u32 (!%p998_p4), %s1070_s14, 3  ;;  %s206_s27 = scalar_lea.sflag (!%p998_p4), [#allocation4], %s1070_s14 }
  0x2b   : > { %s209_s28 = scalar_lea.vmem (!%p998_p4), [#allocation3], %s630_s26 }
  0x2e   : > { %904 = dma.done.wait (%p1030_p12), %s206_s27, 128  }
  0x2f   : > { %906 = vsyncadd (%p1030_p12), %s206_s27, 4294967168 }
  0x30   : > { %908 = dma.done.wait (%p44_p1), [#allocation7], 4992  }
  0x31   : > { %910 = vsyncadd (%p44_p1), [#allocation7], 4294962304  ;;  %s1082_s23 = scalar_lea.vmem [#allocation9], %s630_s26  ;;  %p1161_p3 = scmp.ne.s32.totalorder %s992_s22, 0 }
  0x33   : > { %248 = sbr.rel (%p1161_p3) target bundleno = 58 (0x3a), region = 48 }
  0x38   : > { %v249_v0 = vld [vmem:[#allocation8] sm:$0xff] }
  0x39   : > { %250 = vst [vmem:[#allocation2] sm:$0xff] %v249_v0 }
  0x3a PF: > { %v253_v1 = vld [vmem:[#allocation6 + $0x8] sm:$0xff]  ;;  %v252_v2 = vld [vmem:[#allocation6] sm:$0xff]  ;;  %v251_v3 = vld [vmem:[%s209_s28] sm:$0xff]  ;;  %vm256_vm0 = vcmask 130048   ;;  %vm304_vm1 = vcmask 261120   ;;  %s939_s13 = smov 32  }
  0x3b   : > { %274 = vmatpush.msra.mxu0 %v253_v1  ;;  %v297_v4 = vld [vmem:[#allocation6 + $0x90] sm:$0xff]  ;;  %v296_v5 = vld [vmem:[#allocation6 + $0x88] sm:$0xff]  ;;  %v295_v6 = vld [vmem:[#allocation6 + $0x80] sm:$0xff]  ;;  %s940_s29 = smov 96   ;;  %s941_s30 = smov 64   ;;  %vm388_vm2 = vcmask 523264  }
  0x3c   : > { %308 = vmatpush.msra.mxu1 %v297_v4  ;;  %v301_v7 = vld [vmem:[#allocation6 + $0xb0] sm:$0xff]  ;;  %v294_v8 = vld [vmem:[#allocation6 + $0x78] sm:$0xff]  ;;  %v300_v9 = vld [vmem:[#allocation6 + $0xa8] sm:$0xff]  ;;  %vm451_vm3 = vcmask 785408   ;;  %p639_p1 = scmp.ne.s32.totalorder %s992_s22, 7 }
  0x3d   : > { %275 = vmatpush.msra.mxu0 %v252_v2  ;;  %340 = vmatpush.msra.mxu2 %v301_v7  ;;  %v293_v10 = vld [vmem:[#allocation6 + $0x70] sm:$0xff]  ;;  %v299_v11 = vld [vmem:[#allocation6 + $0xa0] sm:$0xff]  ;;  %v292_v12 = vld [vmem:[#allocation6 + $0x68] sm:$0xff] }
  0x3e   : > { %635 = vmatmul.msk.f32.vlgmr.msra.gmra.mxu0 %vm256_vm0, %v251_v3  ;;  %309 = vmatpush.msra.mxu1 %v296_v5  ;;  %v291_v13 = vld [vmem:[#allocation6 + $0x60] sm:$0xff]  ;;  %v290_v14 = vld [vmem:[#allocation6 + $0x58] sm:$0xff]  ;;  %v289_v15 = vld [vmem:[#allocation6 + $0x50] sm:$0xff] }
  0x3f   : > { %341 = vmatpush.msra.mxu2 %v300_v9  ;;  %v288_v16 = vld [vmem:[#allocation6 + $0x48] sm:$0xff]  ;;  %v287_v17 = vld [vmem:[#allocation6 + $0x40] sm:$0xff]  ;;  %v286_v18 = vld [vmem:[#allocation6 + $0x38] sm:$0xff] }
  0x40   : > { %310 = vmatpush.msra.mxu1 %v295_v6  ;;  %v285_v19 = vld [vmem:[#allocation6 + $0x30] sm:$0xff]  ;;  %v284_v20 = vld [vmem:[#allocation6 + $0x28] sm:$0xff]  ;;  %v298_v21 = vld [vmem:[#allocation6 + $0x98] sm:$0xff] }
  0x41   : > { %342 = vmatpush.msra.mxu2 %v299_v11  ;;  %v281_v22 = vld [vmem:[#allocation2] sm:$0xff]  ;;  %v283_v23 = vld [vmem:[#allocation6 + $0x20] sm:$0xff]  ;;  %v282_v24 = vld [vmem:[#allocation6 + $0x18] sm:$0xff] }
  0x42   : > { %311 = vmatpush.msra.mxu1 %v294_v8  ;;  %v725_v25 = vld [vmem:[#allocation6 + $0x10] ss:$0 sm:$0xff]  ;;  %v726_v29 = vld [vmem:[#allocation6 + $0xb8] ss:$0 sm:$0xff]  ;;  %v378_v48 = vld [vmem:[#allocation6 + $0xe8] sm:$0xff] }
  0x43   : > { %343 = vmatpush.msra.mxu2 %v298_v21  ;;  %v380_v46 = vld [vmem:[#allocation6 + $0xf8] sm:$0xff]  ;;  %v379_v47 = vld [vmem:[#allocation6 + $0xf0] sm:$0xff]  ;;  %v377_v49 = vld [vmem:[#allocation6 + $0xe0] sm:$0xff] }
  0x44   : > { %312 = vmatpush.msra.mxu1 %v293_v10  ;;  %636 = vmatmul.msk.f32.vlgmr.msra.gmra.mxu2 %vm304_vm1, %v281_v22  ;;  %v376_v50 = vld [vmem:[#allocation6 + $0xd8] sm:$0xff]  ;;  %v375_v51 = vld [vmem:[#allocation6 + $0xd0] sm:$0xff]  ;;  %v374_v52 = vld [vmem:[#allocation6 + $0xc8] sm:$0xff] }
  0x45   : > { %400 = vmatpush.msra.mxu3 %v380_v46  ;;  %v373_v55 = vld [vmem:[#allocation6 + $0xc0] sm:$0xff]  ;;  %v456_v10 = vld [vmem:[#allocation6 + $0x118] sm:$0xff]  ;;  %v455_v11 = vld [vmem:[#allocation6 + $0x110] sm:$0xff] }
  0x46   : > { %313 = vmatpush.msra.mxu1 %v292_v12  ;;  %v727_v58 = vld [vmem:[#allocation6 + $0x100] ss:$0 sm:$0xff] }
  0x47   : > { %401 = vmatpush.msra.mxu3 %v379_v47  ;;  %v457_v9 = vld [vmem:[#allocation6 + $0x120] sm:$0xff] }
  0x48   : > { %314 = vmatpush.msra.mxu1 %v291_v13  ;;  %478 = vmatpush.msrb.mxu0 %v457_v9 }
  0x49   : > { %402 = vmatpush.msra.mxu3 %v378_v48 }
  0x4a   : > { %315 = vmatpush.msra.mxu1 %v290_v14  ;;  %479 = vmatpush.msrb.mxu0 %v456_v10 }
  0x4b   : > { %403 = vmatpush.msra.mxu3 %v377_v49 }
  0x4c   : > { %316 = vmatpush.msra.mxu1 %v289_v15  ;;  %480 = vmatpush.msrb.mxu0 %v455_v11  ;;  %v454_v15 = vld [vmem:[#allocation6 + $0x108] sm:$0xff] }
  0x4d   : > { %404 = vmatpush.msra.mxu3 %v376_v50 }
  0x4e   : > { %317 = vmatpush.msra.mxu1 %v288_v16  ;;  %481 = vmatpush.msrb.mxu0 %v454_v15 }
  0x4f   : > { %405 = vmatpush.msra.mxu3 %v375_v51 }
  0x50   : > { %318 = vmatpush.msra.mxu1 %v287_v17 }
  0x51   : > { %406 = vmatpush.msra.mxu3 %v374_v52 }
  0x52   : > { %319 = vmatpush.msra.mxu1 %v286_v18 }
  0x53   : > { %407 = vmatpush.msra.mxu3 %v373_v55 }
  0x54   : > { %320 = vmatpush.msra.mxu1 %v285_v19 }
  0x56   : > { %321 = vmatpush.msra.mxu1 %v284_v20 }
  0x58   : > { %322 = vmatpush.msra.mxu1 %v283_v23  ;;  %v728_v23 = vld [vmem:[#allocation6 + $0x128] ss:$0 sm:$0xff] }
  0x5a   : > { %323 = vmatpush.msra.mxu1 %v282_v24 }
  0xbb   : > { %v277_v26 = vpop.f32.mrf.mxu0 }
  0xbc   : > { %v278_v27 = vadd.f32 %v725_v25, %v277_v26 }
  0xbe   : > { %v280_v28 = vmax.f32 %v278_v27, 0.0 }
  0xc0   : > { %324 = vmatmul.f32.vlgmr.msra.gmra.mxu1 %v280_v28 }
  0xc7   : > { %v345_v31 = vpop.f32.mrf.mxu2 }
 0x13d   : > { %v325_v30 = vpop.f32.mrf.mxu1 }
 0x13e   : > { %v326_v32 = vadd.f32 %v726_v29, %v325_v30 }
 0x140   : > { %v346_v33 = vadd.f32 %v345_v31, %v326_v32 }
 0x142   : > { %729 = vtanh.f32 %v346_v33  ;;  %v348_v35 = vmul.f32 0.5, %v346_v33 }
 0x144   : > { %731 = vtanh.f32 %v348_v35 }
 0x148   : > { %v730_v34 = vpop.eup %729 }
 0x149   : > { %358 = vrot.lane.b32.xlu0 %v730_v34, %s939_s13 }
 0x14a   : > { %v732_v36 = vpop.eup %731 }
 0x14b   : > { %v350_v37 = vmul.f32 0.5, %v732_v36 }
 0x14d   : > { %v351_v38 = vadd.f32 0.5, %v350_v37 }
 0x151   : > { %353 = vrot.lane.b32.xlu0 %v281_v22, %s940_s29 }
 0x159   : > { %417 = vrot.lane.b32.xlu0 %v281_v22, %s941_s30 }
 0x1bb   : > { %v359_v39 = vpop.permute.xlu0 %358 }
 0x1bc   : > { %v361_v40 = vmul.f32 %v359_v39, %v351_v38 }
 0x1be   : > { %363 = vrot.lane.b32.xlu1 %v361_v40, %s939_s13 }
 0x1c3   : > { %v354_v41 = vpop.permute.xlu0 %353 }
 0x1c4   : > { %v356_v42 = vmul.f32 %v354_v41, %v351_v38 }
 0x1cb   : > { %v418_v4 = vpop.permute.xlu0 %417 }
 0x230   : > { %v364_v43 = vpop.permute.xlu1 %363 }
 0x231   : > { %v366_v44 = vadd.f32 %v364_v43, %v356_v42 }
 0x233   : > { %733 = vtanh.f32 %v366_v44 }
 0x239   : > { %v734_v45 = vpop.eup %733 }
 0x23a   : > { %369 = vrot.lane.b32.xlu1 %v734_v45, %s939_s13 }
 0x2ac   : > { %v370_v53 = vpop.permute.xlu1 %369 }
 0x2ad   : > { %v372_v54 = vmul.f32 %v370_v53, %v351_v38 }
 0x2af   : > { %383 = vrot.lane.b32.xlu2 %v372_v54, %s941_s30 }
 0x309   : > { %v384_v56 = vpop.permute.xlu2 %383 }
 0x30a   : > { %v386_v57 = vsel %vm304_vm1, %v384_v56, %v281_v22 }
 0x30b   : > { %637 = vmatmul.msk.f32.vlgmr.msra.gmra.mxu3 %vm388_vm2, %v386_v57 }
 0x38e   : > { %v409_v59 = vpop.f32.mrf.mxu3 }
 0x38f   : > { %v410_v60 = vadd.f32 %v727_v58, %v409_v59 }
 0x391   : > { %735 = vtanh.f32 %v410_v60  ;;  %v412_v62 = vmul.f32 0.5, %v410_v60 }
 0x393   : > { %737 = vtanh.f32 %v412_v62 }
 0x397   : > { %v736_v61 = vpop.eup %735 }
 0x398   : > { %422 = vrot.lane.b32.xlu2 %v736_v61, %s939_s13 }
 0x399   : > { %v738_v63 = vpop.eup %737 }
 0x39a   : > { %v414_v0 = vmul.f32 0.5, %v738_v63 }
 0x39c   : > { %v415_v1 = vadd.f32 0.5, %v414_v0 }
 0x39e   : > { %v420_v5 = vmul.f32 %v418_v4, %v415_v1 }
 0x3f2   : > { %v423_v2 = vpop.permute.xlu2 %422 }
 0x3f3   : > { %v425_v3 = vmul.f32 %v423_v2, %v415_v1 }
 0x3f5   : > { %427 = vrot.lane.b32.xlu1 %v425_v3, %s939_s13 }
 0x467   : > { %v428_v6 = vpop.permute.xlu1 %427 }
 0x468   : > { %v430_v7 = vadd.f32 %v428_v6, %v420_v5 }
 0x46a   : > { %739 = vtanh.f32 %v430_v7 }
 0x470   : > { %v740_v8 = vpop.eup %739 }
 0x471   : > { %433 = vrot.lane.b32.xlu2 %v740_v8, %s939_s13 }
 0x479   : > { %442 = vrot.lane.b32.xlu2 %v366_v44, %s939_s13 }
 0x4cb   : > { %v434_v12 = vpop.permute.xlu2 %433 }
 0x4cc   : > { %v436_v13 = vmul.f32 %v434_v12, %v415_v1 }
 0x4ce   : > { %v459_v14 = vmax.f32 %v436_v13, 0.0  ;;  %438 = vrot.lane.b32.xlu1 %v436_v13, %s940_s29 }
 0x4d0   : > { %462 = vrot.lane.b32.xlu0 %v459_v14, %s941_s30 }
 0x4d3   : > { %v443_v19 = vpop.permute.xlu2 %442 }
 0x4d8   : > { %446 = vrot.lane.b32.xlu0 %v430_v7, %s941_s30 }
 0x540   : > { %v439_v17 = vpop.permute.xlu1 %438 }
 0x541   : > { %v449_v18 = vsel %vm304_vm1, %v384_v56, %v439_v17 }
 0x542   : > { %v463_v16 = vpop.permute.xlu0 %462  ;;  %v450_v21 = vsel %vm388_vm2, %v449_v18, %v443_v19 }
 0x543   : > { %638 = vmatmul.msk.f32.vlgmr.msrb.gmra.mxu0 %vm304_vm1, %v463_v16 }
 0x54a   : > { %v447_v20 = vpop.permute.xlu0 %446 }
 0x54b   : > { %v452_v22 = vsel %vm451_vm3, %v450_v21, %v447_v20 }
 0x54c   : > { %453 = vst [vmem:[#allocation2] sm:$0xff] %v452_v22 }
 0x5bf   : > { %490 = sbr.rel (%p639_p1) target bundleno = 1478 (0x5c6), region = 52 }
 0x5c0   : > { %v483_v24 = vpop.f32.mrf.mxu0 }
 0x5c1   : > { %v484_v25 = vadd.f32 %v728_v23, %v483_v24 }
 0x5c3   : > { %486 = vst [vmem:[%s1082_s23] sm:$0xff] %v484_v25 }
 0x5c4   : > { %v491_v26 = vld [vmem:[#allocation2] sm:$0xff] }
 0x5c5   : > { %492 = vst [vmem:[#allocation10] sm:$0xff] %v491_v26 }
 0x5c6 PF: > { %s641_s5 = sshll.u32 %s992_s22, 3  ;;  %s506_s10 = sshll.u32 %s1082_s23, 4  ;;  %s507_s10 = int_to_ptr.vmem [resolvable:$true] %s506_s10 }
 0x5c7   : > { %s504_s9 = scalar_lea.hbm %s1152_s3, %s641_s5  ;;  %s494_s24 = scalar_lea.sflag [#allocation5], %s1070_s14 }
 0x5c8   : > { %s508_s21 = sshll.u32 %s504_s9, 4  ;;  %s851_s28 = scalar_lea.hbm %s1152_s3, 64  ;;  %s509_s21 = int_to_ptr.hbm [resolvable:$true] %s508_s21 }
 0x5c9   : > { %s845_s25 = sshra.s32 %s509_s21, 4  ;;  %s846_s25 = int_to_ptr.hbm [resolvable:$true] %s845_s25 }
 0x5ca   : > { %s847_s12 = scalar_lea.hbm %s846_s25, 8  ;;  %p852_p7 = scmp.lt.s32.totalorder %s846_s25, %s1152_s3 }
 0x5cb   : > { %p848_p4 = scmp.ne.s32.totalorder %s846_s25, %s847_s12  ;;  %p853_p8 = scmp.lt.s32.totalorder %s851_s28, %s847_s12 }
 0x5cd   : > { %p849_p12 = pnand %p848_p4, %p1039_p5  ;;  %p854_p9 = por %p853_p8, %p852_p7 }
 0x5cf   : > { %p850_p13 = pneg %p849_p12 }
 0x5d1   : > { %p855_p10 = pnand %p854_p9, %p850_p13 }
 0x5d3   : > { %858 = shalt.err (!%p855_p10)
}
 0x5d4   : > { %656 = dma.vmem_to_hbm [thread:$0]  (%p1039_p5), %s507_s10, 128, %s509_s21, %s494_s24  }
 0x5d5   : > { %s942_s14 = smov [#allocation10]   ;;  %s520_s6 = sshll.u32 %s1153_s4, 4  ;;  %s521_s6 = int_to_ptr.hbm [resolvable:$true] %s520_s6 }
 0x5d6   : > { %s518_s23 = sshll.u32 %s942_s14, 4  ;;  %p1162_p0 = scmp.eq.s32.totalorder %s992_s22, 7  ;;  %s519_s23 = int_to_ptr.vmem [resolvable:$true] %s518_s23 }
 0x5d8   : > { %658 = dma.vmem_to_hbm [thread:$0]  (%p1162_p0), %s519_s23, 128, %s521_s6, [#allocation11]  }
 0x5d9   : > { %p1163_p11 = pmov %p1162_p0 }
 0x5da   : > { %p1164_p2 = pmov %p1162_p0 }
 0x5db   : > { %912 = dma.done.wait (%p1163_p11), [#allocation11], 128  }
 0x5dc   : > { %914 = vsyncadd (%p1164_p2), [#allocation11], 4294967168 }
 0x5dd PF: > { %p684_p5 = scmp.ge.s32.totalorder %s933_s18, 2  ;;  %s537_s19 = sand.u32 1, %s921_s15  }
 0x5de   : > { %s538_s7 = scalar_lea.sflag [#allocation5], %s537_s19 }
 0x5df   : > { %p674_p3 = pnand %p684_p5, %p1043_p6 }
 0x5e1   : > { %p675_p1 = pneg %p674_p3 }
 0x5e3   : > { %916 = dma.done.wait (%p675_p1), %s538_s7, 128  }
 0x5e4   : > { %918 = vsyncadd (%p675_p1), %s538_s7, 4294967168  ;;  %p20_p4 = scmp.ge.s32.totalorder %s1011_s8, 10   ;;  %s1165_s15 = smov %s925_s16 }
 0x5e5   : > { %s1166_s16 = smov %s929_s17  ;;  %s1167_s17 = smov %s1022_s11 }
 0x5e6   : > { %s1168_s18 = smov %s1011_s8  ;;  %22 = sbr.rel (!%p20_p4) target bundleno = 7 (0x7), region = 101 }
 0x5eb   :  { %544 = vsyncpa [#allocation4], 1 }
 0x5ec   :  { %546 = vsyncpa [#allocation4 + $0x1], 1 }
 0x5ed   :  { %547 = vsyncpa [#allocation7], 1 }
 0x5ee   :  { %548 = vsyncpa [#allocation5], 1 }
 0x5ef   :  { %550 = vsyncpa [#allocation5 + $0x1], 1 }
 0x5f0   :  { %551 = vsyncpa [#allocation11], 1 }

</bundles_post_ra>
